<compile_context>
chip_gen: v6e
topology: v6e:2x2x1
jax: 0.10.0
libtpu: 0.0.40
codegen_flags: <defaults>
</compile_context>

<pallas_src>
from functools import partial

import jax
import jax.numpy as jnp
import numpy as np
from jax.experimental import pallas as pl
from jax.experimental.pallas import tpu as pltpu


# ---------------- Pallas kernel: dynamic-ReLU application ----------------
def dyrelu_apply_kernel(coef_ref, x_ref, o_ref, *, M):
    """One (TR, TL) lane-dense tile of  out = max_m(a_m * x + b_m)."""
    xv = x_ref[...]                       # (TR, TL) tile of the feature map
    coefs = coef_ref[...]                 # (TR, 2M) f32; [:, :M]=a, [:, M:]=b
    res = xv * coefs[:, 0:1] + coefs[:, M:M + 1]
    for m in range(1, M):                 # M is tiny (2): static unroll
        res = jnp.maximum(res, xv * coefs[:, m:m + 1] + coefs[:, M + m:M + m + 1])
    o_ref[...] = res.astype(o_ref.dtype)


# ---------------- tiling / VMEM budgeting helpers ----------------
def _round_up(x, m):
    return ((x + m - 1) // m) * m


def _round_down(x, m):
    return max(m, (x // m) * m)


def _vmem_capacity_bytes():
    try:
        return int(pltpu.get_tpu_info().vmem_capacity_bytes)
    except Exception:
        return 64 * 1024 * 1024           # conservative fallback (v7x per-TC)


def _pick_tiles(rows, lanes, dtype_bytes):
    """Pick (TR, TL): lane tile grown first, sized against physical VMEM.

    Per-buffer budget ~ VMEM/16 (~4 MiB on v7x, ~8 MiB on v5e/v6e); with
    2x(in)+2x(out) live x/out buffers plus the lane-padded coef double-buffer
    the total live VMEM stays around VMEM/4.  No divisibility requirement:
    the caller uses cdiv grids with masked edge blocks.
    """
    phys = _vmem_capacity_bytes()
    sub = 16 if dtype_bytes < 4 else 8     # bf16 packs (16,128); f32 (8,128)

    tile_budget = max(phys // 16, sub * 128 * dtype_bytes)
    budget_elems = tile_budget // dtype_bytes

    lane_full = _round_up(lanes, 128)
    row_full = _round_up(rows, sub)

    # Lane tile first: widest multiple of 128 the budget allows (unmasked vst).
    tl = min(lane_full, _round_down(budget_elems // sub, 128))

    # Then rows, charging 2x(in)+2x(out) x rows plus 2 lane-padded f32 coef rows.
    live_budget = 4 * tile_budget
    per_row_bytes = 4 * tl * dtype_bytes + 2 * 128 * 4
    tr = min(row_full, _round_down(live_budget // per_row_bytes, sub))

    # Keep >= 2 grid steps on a "parallel" axis when possible (v7x 2-TC sharding).
    if pl.cdiv(rows, tr) == 1 and pl.cdiv(lanes, tl) == 1:
        if row_full > sub:
            tr = _round_up(pl.cdiv(rows, 2), sub)
        elif lane_full > 128:
            tl = _round_up(pl.cdiv(lanes, 2), 128)
    return tr, tl


def _vmem_limit_bytes(tr, tl, dtype_bytes, phys):
    # 2x(in)+2x(out) x/out tiles + double-buffered lane-padded coef block + slack.
    need = 4 * tr * tl * dtype_bytes + 2 * _round_up(tr, 8) * 128 * 4 + (2 << 20)
    return int(min(max(need, 32 << 20), int(phys * 0.9)))


# ---------------- forward ----------------
@partial(jax.jit, static_argnames=("M",))
def dyrelub_forward(x, g, w, b, lambdas, init_v, *, M=2):
    """DyReLUB.forward.

    x: (N, C, H, W); g: tuple whose first entry flattens to (N, context_dim);
    w: (2*M*C, context_dim); b: (2*M*C,); lambdas/init_v: (2*M,).
    """
    N, C, H, W = x.shape

    # --- coefficient net: tiny GEMM + pointwise; plain JAX (sub-1% of one MXU
    #     pass — a separate pallas_call would only add launch + HBM traffic) ---
    h_c = g[0].reshape(N, -1)                              # g[0].view(b, -1)
    z = h_c @ w.T + b                                      # (N, 2*M*C)
    theta = jnp.tanh(0.5 * z)                              # == 2*sigmoid(z) - 1
    coefs = theta.reshape(N, C, 2 * M) * lambdas + init_v  # (N, C, 2M)
    coefs = coefs.reshape(N * C, 2 * M).astype(jnp.float32)

    # --- lane-dense, HBM-bound Pallas apply kernel over the flattened map ---
    rows, lanes = N * C, H * W
    x2 = x.reshape(rows, lanes)                            # free (row-major NCHW)
    dtype_bytes = x2.dtype.itemsize
    tr, tl = _pick_tiles(rows, lanes, dtype_bytes)
    grid = (pl.cdiv(rows, tr), pl.cdiv(lanes, tl))         # masked edge blocks

    cost = pl.CostEstimate(
        flops=rows * lanes * (3 * M - 1),                  # M mul + M add + (M-1) max
        transcendentals=0,
        bytes_accessed=2 * rows * lanes * dtype_bytes + rows * 2 * M * 4,
    )

    out2 = pl.pallas_call(
        partial(dyrelu_apply_kernel, M=M),
        out_shape=jax.ShapeDtypeStruct((rows, lanes), x.dtype),
        grid=grid,
        in_specs=[
            # Coef block: index_map constant across the inner (lane) axis, so
            # its DMA is skipped while streaming lane tiles. Do NOT flip the
            # grid order or this small DMA re-fires every step.
            pl.BlockSpec((tr, 2 * M), lambda r, l: (r, 0)),
            pl.BlockSpec((tr, tl), lambda r, l: (r, l)),   # x tile
        ],
        out_specs=pl.BlockSpec((tr, tl), lambda r, l: (r, l)),
        input_output_aliases={1: 0},                       # write out in place of x2
        cost_estimate=cost,
        compiler_params=pltpu.CompilerParams(
            dimension_semantics=("parallel", "parallel"),
            vmem_limit_bytes=_vmem_limit_bytes(
                tr, tl, dtype_bytes, _vmem_capacity_bytes()),
        ),
    )(coefs, x2)

    return out2.reshape(N, C, H, W)


def dyrelub_reference(x, g, w, b, lambdas, init_v, *, M=2):
    """Pure-JAX mirror of the PyTorch DyReLUB.forward for correctness checks."""
    N, C, H, W = x.shape
    h_c = g[0].reshape(N, -1)
    theta = h_c @ w.T + b
    theta = 2.0 * jax.nn.sigmoid(theta) - 1.0
    relu_coefs = theta.reshape(N, C, 1, 1, 2 * M) * lambdas + init_v
    x_mapped = x[..., None] * relu_coefs[..., :M] + relu_coefs[..., M:]
    return jnp.max(x_mapped, axis=-1)


if __name__ == "__main__":
    # Small shapes consistent with the module: channels=4, context_dim=32, M=2.
    N, C, H, W = 2, 4, 16, 16
    context_dim = 32
    M = 2
    out_features = 2 * M * C                       # DyReLUB: Linear -> 2*M*channels

    key = jax.random.PRNGKey(0)
    kx, kg, kw, kb = jax.random.split(key, 4)

    x = jax.random.normal(kx, (N, C, H, W), dtype=jnp.float32)
    g0 = jax.random.normal(kg, (N, context_dim), dtype=jnp.float32)
    g = (g0,)                                      # forward uses g[0].view(b, -1)

    # Deterministic nn.Linear(context_dim, 2*M*channels)-shaped parameters.
    bound = 1.0 / np.sqrt(context_dim)
    w = jax.random.uniform(kw, (out_features, context_dim), jnp.float32, -bound, bound)
    b = jax.random.uniform(kb, (out_features,), jnp.float32, -bound, bound)

    # Registered buffers.
    lambdas = jnp.array([1.0] * M + [0.5] * M, dtype=jnp.float32)
    init_v = jnp.array([1.0] + [0.0] * (2 * M - 1), dtype=jnp.float32)

    ref = dyrelub_reference(x, g, w, b, lambdas, init_v, M=M)
    out = jax.block_until_ready(dyrelub_forward(x, g, w, b, lambdas, init_v, M=M))
    np.testing.assert_allclose(np.asarray(out), np.asarray(ref), rtol=1e-5, atol=1e-5)

    print("KERNEL_OK")
</pallas_src>

<mosaic_0001>
module attributes {stable_mosaic.version = 11 : i64} {
  func.func @dyrelu_apply_kernel(%arg0: i32, %arg1: i32, %arg2: memref<8x4xf32, #tpu.memory_space<vmem>>, %arg3: memref<8x128xf32, #tpu.memory_space<vmem>>, %arg4: memref<8x128xf32, #tpu.memory_space<vmem>>) attributes {dimension_semantics = [#tpu.dimension_semantics<parallel>, #tpu.dimension_semantics<parallel>], iteration_bounds = array<i64: 1, 2>, scalar_prefetch = 0 : i64, scratch_operands = 0 : i64, tpu.core_type = #tpu.core_type<tc>, window_params = [{transform_indices = @transform_0, window_bounds = array<i64: 8, 4>}, {transform_indices = @transform_1, window_bounds = array<i64: 8, 128>}, {transform_indices = @transform_2, window_bounds = array<i64: 8, 128>}]} {
    %c0 = arith.constant 0 : index
    %c0_0 = arith.constant 0 : index
    %0 = vector.load %arg3[%c0, %c0_0] : memref<8x128xf32, #tpu.memory_space<vmem>>, vector<8x128xf32>
    %c0_1 = arith.constant 0 : index
    %c0_2 = arith.constant 0 : index
    %1 = vector.load %arg2[%c0_1, %c0_2] : memref<8x4xf32, #tpu.memory_space<vmem>>, vector<8x4xf32>
    %2 = vector.extract_strided_slice %1 {offsets = [0, 0], sizes = [8, 1], strides = [1, 1]} : vector<8x4xf32> to vector<8x1xf32>
    %3 = vector.broadcast %2 : vector<8x1xf32> to vector<8x128xf32>
    %4 = arith.mulf %0, %3 : vector<8x128xf32>
    %5 = vector.extract_strided_slice %1 {offsets = [0, 2], sizes = [8, 1], strides = [1, 1]} : vector<8x4xf32> to vector<8x1xf32>
    %6 = vector.broadcast %5 : vector<8x1xf32> to vector<8x128xf32>
    %7 = arith.addf %4, %6 : vector<8x128xf32>
    %8 = vector.extract_strided_slice %1 {offsets = [0, 1], sizes = [8, 1], strides = [1, 1]} : vector<8x4xf32> to vector<8x1xf32>
    %9 = vector.broadcast %8 : vector<8x1xf32> to vector<8x128xf32>
    %10 = arith.mulf %0, %9 : vector<8x128xf32>
    %11 = vector.extract_strided_slice %1 {offsets = [0, 3], sizes = [8, 1], strides = [1, 1]} : vector<8x4xf32> to vector<8x1xf32>
    %12 = vector.broadcast %11 : vector<8x1xf32> to vector<8x128xf32>
    %13 = arith.addf %10, %12 : vector<8x128xf32>
    %14 = arith.maximumf %7, %13 : vector<8x128xf32>
    %c0_3 = arith.constant 0 : index
    %c0_4 = arith.constant 0 : index
    %15 = vector.load %arg4[%c0_3, %c0_4] : memref<8x128xf32, #tpu.memory_space<vmem>>, vector<8x128xf32>
    tpu.vector_store %arg4[%c0_3, %c0_4], %14 {strides = array<i32>} : memref<8x128xf32, #tpu.memory_space<vmem>>, vector<8x128xf32>,
    return
  }
  func.func @transform_0(%arg0: i32, %arg1: i32) -> (i32, i32) {
    %c0_i32 = arith.constant 0 : i32
    %c0_i32_0 = arith.constant 0 : i32
    return %arg0, %c0_i32 : i32, i32
  }
  func.func @transform_1(%arg0: i32, %arg1: i32) -> (i32, i32) {
    %c0_i32 = arith.constant 0 : i32
    return %arg0, %arg1 : i32, i32
  }
  func.func @transform_2(%arg0: i32, %arg1: i32) -> (i32, i32) {
    %c0_i32 = arith.constant 0 : i32
    return %arg0, %arg1 : i32, i32
  }
}

</mosaic_0001>

<bundles_post_ra>
// kernel: dyrelub_forward.1
= control target key start
LH: loop header
LB: loop body
LE: loop exit
PB: predicated region body
PF: predicated region fallthrough
CT: control target
= control target key end

     0   :  { %s402_s9 = smov 0   ;;  %s404_s10 = smov 0   ;;  %s438_s0 = inlined_call_operand.vmem [shape: f32[8,4], index: 0, kind: input, shape index: {}]   ;;  %s439_s1 = inlined_call_operand.vmem [shape: f32[8,256], index: 1, kind: input, shape index: {}, may-alias: {1,2}]   ;;  %s440_s2 = inlined_call_operand.vmem [shape: f32[8,256], index: 2, kind: output, shape index: {}, may-alias: {1,2}]  }
   0x1   :  { %s406_s11 = smov 0  }
   0x2 LB: > { %s21_s12 = sadd.s32 1, %s377_s10  ;;  %p321_p0 = scmp.ge.s32.totalorder %s381_s11, 1  ;;  %s381_s11 = sphi %s406_s11, %s12_s11   ;;  %s377_s10 = sphi %s404_s10, %s442_s10   ;;  %s373_s9 = sphi %s402_s9, %s441_s9  }
   0x3   : > { %p22_p1 = scmp.ge.s32.totalorder %s21_s12, 2  ;;  %p140_p2 = scmp.lt.s32.totalorder %s381_s11, 3 }
   0x5   : > { %s444_s12 = smov (%p22_p1, %s21_s12), 0  ;;  %p141_p3 = pnand %p321_p0, %p140_p2 }
   0x6   : > { %p178_p4 = scmp.lt.s32.totalorder (!%p141_p3), %s373_s9, 1 }
   0x7   : > { %144 = sbr.rel (%p141_p3) target bundleno = 150 (0x96), region = 28 }
   0xc   : > { %v193_v0 = vld [vmem:[%s438_s0] sm:$0xff]  ;;  %v383_v1 = vmov 0   ;;  %v384_v2 = vmov 2   ;;  %v385_v3 = vmov 1   ;;  %v386_v4 = vmov 3   ;;  %s446_s9 = smov (!%p178_p4, %s373_s9), 1 }
   0xd   : > { %354 = vset.pattern.permute.xlu0 %v383_v1  ;;  %356 = vset.pattern.permute.xlu1 %v384_v2  ;;  %s322_s15 = sshll.u32 %s446_s9, 3 }
   0xe   : > { %196 = vperm.xlu0 %354, %v193_v0   ;;  %201 = vperm.xlu1 %356, %v193_v0   ;;  %s183_s18 = scalar_lea.vmem %s439_s1, %s322_s15  ;;  %s191_s21 = scalar_lea.vmem %s440_s2, %s322_s15 }
   0xf   : > { %v192_v7 = vld [vmem:[%s183_s18] sm:$0xff] }
  0x12   : > { %355 = vset.pattern.permute.xlu0 %v385_v3  ;;  %357 = vset.pattern.permute.xlu1 %v386_v4 }
  0x13   : > { %206 = vperm.xlu0 %355, %v193_v0   ;;  %211 = vperm.xlu1 %357, %v193_v0  }
  0x17   : > { %358 = vset.pattern.permute.xlu0 %v386_v4 }
  0x89   : > { %v197_v5 = vpop.permute.xlu0 %196  ;;  %v202_v6 = vpop.permute.xlu1 %201 }
  0x8a   : > { %v199_v8 = vmul.f32 %v197_v5, %v192_v7 }
  0x8c   : > { %v204_v12 = vadd.f32 %v202_v6, %v199_v8 }
  0x8e   : > { %v207_v9 = vpop.permute.xlu0 %206  ;;  %v212_v10 = vpop.permute.xlu1 %211 }
  0x8f   : > { %v209_v11 = vmul.f32 %v207_v9, %v192_v7 }
  0x91   : > { %v214_v13 = vadd.f32 %v212_v10, %v209_v11 }
  0x93   : > { %v215_v14 = vmax.f32 %v204_v12, %v214_v13 }
  0x95   : > { %216 = vst [vmem:[%s191_s21] sm:$0xff] %v215_v14 }
  0x96 PF: > { %s12_s11 = sadd.s32 1, %s381_s11   ;;  %s441_s9 = smov %s377_s10 }
  0x97   : > { %p9_p5 = scmp.ge.s32.totalorder %s12_s11, 4   ;;  %s442_s10 = smov %s444_s12 }
  0x99   :  { %11 = sbr.rel (!%p9_p5) target bundleno = 2 (0x2), region = 61 }

</bundles_post_ra>
